<compile_context>
chip_gen: v5e
topology: v5e:2x2
jax: 0.10.0
libtpu: 0.0.40
codegen_flags: <defaults>
</compile_context>

<pallas_src>
import math

import jax
import jax.numpy as jnp
from jax.experimental import pallas as pl
from jax.experimental.pallas import tpu as pltpu


def _gelu(x):
    # TODO(synk): nn.GELU() default is exact (erf) GELU; using the tanh
    # approximation for guaranteed Mosaic lowering (~1e-3 max abs deviation).
    return jax.nn.gelu(x, approximate=True)


# ----------------------------------------------------------------------------
# Kernel:  out = GELU(x @ W1 + b1) @ W2 + b2     (dropout p=0.0 -> identity)
# ----------------------------------------------------------------------------
def _ffn_kernel(x_ref, w1_ref, b1_ref, w2_ref, b2_ref, o_ref):
    # (TILE, D) @ (D, M) -> (TILE, M); bf16 inputs, f32 accumulation on MXU.
    h = jnp.dot(x_ref[...].astype(jnp.bfloat16), w1_ref[...],
                preferred_element_type=jnp.float32)
    h = h + b1_ref[...]                       # f32 bias add
    h = _gelu(h.astype(jnp.bfloat16))         # bf16 GELU / hidden slab
    # (TILE, M) @ (M, D) -> (TILE, D); f32 accumulation.
    y = jnp.dot(h, w2_ref[...], preferred_element_type=jnp.float32)
    y = y + b2_ref[...]
    # TODO(synk): nn.Dropout(p=0.0) is the identity; no kernel work needed.
    o_ref[...] = y.astype(o_ref.dtype)        # lane-dense (full-D) store


# ----------------------------------------------------------------------------
# Wrapper helpers
# ----------------------------------------------------------------------------
def _vmem_capacity_bytes():
    try:
        return int(pltpu.get_tpu_info().vmem_capacity_bytes)
    except Exception:
        return 64 * 2**20                     # conservative: v7x physical VMEM


def _pick_tile_rows(n_rows, max_tile):
    """Row tile: full extent if it fits, else a large multiple of 256/128/8,
    preferring one that divides n_rows evenly (ragged tail is masked)."""
    if n_rows <= max_tile:
        return n_rows                         # full-extent block is always legal
    unit = 256 if max_tile >= 256 else (128 if max_tile >= 128 else 8)
    top = max_tile - (max_tile % unit)
    for cand in range(top, unit - 1, -unit):
        if n_rows % cand == 0:
            return cand
    return top                                # ragged last block; Pallas masks it


def _resident_spec(shape):
    """Constant-index BlockSpec for resident operands; single-buffered when the
    jax version supports pipeline_mode (their index_map never changes)."""
    index_map = lambda i: (0,) * len(shape)
    try:
        return pl.BlockSpec(shape, index_map, pipeline_mode=pl.Buffered(1))
    except Exception:                         # fallback: default double-buffering
        return pl.BlockSpec(shape, index_map)


def feed_forward(x, w1, b1, w2, b2, *, max_tile_rows=1024):
    """Pallas FeedForward.  x: (B, L, D) f32 or bf16; w1/w2 bf16; b1/b2 f32.
    Output dtype matches x's dtype."""
    B, L, D = x.shape
    M = w1.shape[1]
    N = B * L
    x2 = x.reshape(N, D)
    out_dtype = x.dtype

    cap = _vmem_capacity_bytes() * 3 // 4     # ~48 MiB v7x, ~96 MiB v5e/v6e

    def need(t):
        return (2 * t * D * x2.dtype.itemsize                 # x tiles (2x buf)
                + 2 * t * D * jnp.dtype(out_dtype).itemsize   # out tiles (2x buf)
                + t * M * (4 + 2)                             # f32 acc + bf16 hidden
                + 2 * (D * M + M * D)                         # resident bf16 weights
                + 4 * (M + D)                                 # biases
                + (2 << 20))                                  # slack

    tile = _pick_tile_rows(N, max_tile_rows)
    while need(tile) > cap and tile > 128:
        tile = _pick_tile_rows(N, max(tile // 2, 128))
    # TODO(synk): if the resident bf16 weights alone exceed the VMEM cap (very
    # large D*M on v7x), an M-tiled reduction path with an f32 accumulator
    # scratch would be required instead of fully-resident weights.

    vmem_limit = int(min(max(need(tile), 32 << 20), cap))
    grid = (pl.cdiv(N, tile),)

    y2 = pl.pallas_call(
        _ffn_kernel,
        out_shape=jax.ShapeDtypeStruct((N, D), out_dtype),
        grid_spec=pltpu.PrefetchScalarGridSpec(
            num_scalar_prefetch=0,
            grid=grid,
            in_specs=[
                pl.BlockSpec((tile, D), lambda i: (i, 0)),    # x row-tile
                _resident_spec((D, M)),                       # W1 (bf16, resident)
                _resident_spec((1, M)),                       # b1
                _resident_spec((M, D)),                       # W2 (bf16, resident)
                _resident_spec((1, D)),                       # b2
            ],
            out_specs=pl.BlockSpec((tile, D), lambda i: (i, 0)),
        ),
        compiler_params=pltpu.CompilerParams(
            dimension_semantics=("parallel",),                # independent row tiles
            vmem_limit_bytes=vmem_limit,
        ),
    )(x2, w1, b1, w2, b2)
    return y2.reshape(B, L, D)


# ----------------------------------------------------------------------------
# Pure-JAX reference (same bf16 matmul inputs / f32 accumulation) + init
# ----------------------------------------------------------------------------
def feed_forward_ref(x, w1, b1, w2, b2):
    h = jnp.dot(x.astype(jnp.bfloat16), w1,
                preferred_element_type=jnp.float32) + b1
    h = _gelu(h.astype(jnp.bfloat16))
    y = jnp.dot(h, w2, preferred_element_type=jnp.float32) + b2
    return y.astype(x.dtype)


def init_params(key, dim, hidden_dim):
    # PyTorch nn.Linear default init: U(-1/sqrt(fan_in), 1/sqrt(fan_in)).
    k1, k2, k3, k4 = jax.random.split(key, 4)

    def unif(k, shape, fan_in):
        b = 1.0 / math.sqrt(fan_in)
        return jax.random.uniform(k, shape, jnp.float32, -b, b)

    w1 = unif(k1, (dim, hidden_dim), dim).astype(jnp.bfloat16)
    b1 = unif(k2, (1, hidden_dim), dim)        # biases stay f32 (added to f32 acc)
    w2 = unif(k3, (hidden_dim, dim), hidden_dim).astype(jnp.bfloat16)
    b2 = unif(k4, (1, dim), hidden_dim)
    return w1, b1, w2, b2


if __name__ == "__main__":
    B, L = 2, 64
    dim, hidden_dim = 128, 256                 # lane-aligned (multiples of 128)

    key = jax.random.PRNGKey(0)
    kx, kp = jax.random.split(key)
    x = jax.random.normal(kx, (B, L, dim), jnp.float32)
    w1, b1, w2, b2 = init_params(kp, dim, hidden_dim)

    # Small max_tile so the demo actually exercises a multi-step 1-D grid
    # (B*L = 128 rows -> 4 tiles of 32 rows); production default is 1024.
    y = feed_forward(x, w1, b1, w2, b2, max_tile_rows=32)
    y = jax.block_until_ready(y)

    y_ref = feed_forward_ref(x, w1, b1, w2, b2)
    assert y.shape == (B, L, dim)
    assert bool(jnp.all(jnp.isfinite(y)))
    err = float(jnp.max(jnp.abs(y - y_ref)))
    assert err < 1e-2, f"max abs diff vs reference = {err}"
    print("KERNEL_OK")
</pallas_src>

<mosaic_0001>
module attributes {stable_mosaic.version = 11 : i64} {
  func.func @_ffn_kernel(%arg0: i32, %arg1: memref<32x128xf32, #tpu.memory_space<vmem>>, %arg2: memref<128x256xbf16, #tpu.memory_space<vmem>>, %arg3: memref<1x256xf32, #tpu.memory_space<vmem>>, %arg4: memref<256x128xbf16, #tpu.memory_space<vmem>>, %arg5: memref<1x128xf32, #tpu.memory_space<vmem>>, %arg6: memref<32x128xf32, #tpu.memory_space<vmem>>) attributes {dimension_semantics = [#tpu.dimension_semantics<parallel>], iteration_bounds = array<i64: 4>, scalar_prefetch = 0 : i64, scratch_operands = 0 : i64, tpu.core_type = #tpu.core_type<tc>, window_params = [{transform_indices = @transform_0, window_bounds = array<i64: 32, 128>}, {pipeline_mode = #tpu.pipeline_mode<synchronous>, transform_indices = @transform_1, window_bounds = array<i64: 128, 256>}, {pipeline_mode = #tpu.pipeline_mode<synchronous>, transform_indices = @transform_2, window_bounds = array<i64: 1, 256>}, {pipeline_mode = #tpu.pipeline_mode<synchronous>, transform_indices = @transform_3, window_bounds = array<i64: 256, 128>}, {pipeline_mode = #tpu.pipeline_mode<synchronous>, transform_indices = @transform_4, window_bounds = array<i64: 1, 128>}, {transform_indices = @transform_5, window_bounds = array<i64: 32, 128>}]} {
    %c0 = arith.constant 0 : index
    %c0_0 = arith.constant 0 : index
    %0 = vector.load %arg1[%c0, %c0_0] : memref<32x128xf32, #tpu.memory_space<vmem>>, vector<32x128xf32>
    %1 = arith.truncf %0 : vector<32x128xf32> to vector<32x128xbf16>
    %c0_1 = arith.constant 0 : index
    %c0_2 = arith.constant 0 : index
    %2 = vector.load %arg2[%c0_1, %c0_2] : memref<128x256xbf16, #tpu.memory_space<vmem>>, vector<128x256xbf16>
    %cst = arith.constant dense<0.000000e+00> : vector<32x256xf32>
    %3 = tpu.matmul %1, %2, %cst {dimension_numbers = #tpu.dot_dimension_numbers<[1], [0], [0], [1], [0, 0, 1, 1], [], []>} : vector<32x128xbf16>, vector<128x256xbf16>, vector<32x256xf32> -> vector<32x256xf32>
    %c0_3 = arith.constant 0 : index
    %c0_4 = arith.constant 0 : index
    %4 = vector.load %arg3[%c0_3, %c0_4] : memref<1x256xf32, #tpu.memory_space<vmem>>, vector<1x256xf32>
    %5 = vector.broadcast %4 : vector<1x256xf32> to vector<32x256xf32>
    %6 = arith.addf %3, %5 : vector<32x256xf32>
    %7 = arith.truncf %6 : vector<32x256xf32> to vector<32x256xbf16>
    %8 = arith.mulf %7, %7 : vector<32x256xbf16>
    %9 = arith.mulf %7, %8 : vector<32x256xbf16>
    %cst_5 = arith.constant 4.467770e-02 : bf16
    %10 = vector.broadcast %cst_5 : bf16 to vector<32x256xbf16>
    %11 = arith.mulf %10, %9 : vector<32x256xbf16>
    %12 = arith.addf %7, %11 : vector<32x256xbf16>
    %cst_6 = arith.constant 7.968750e-01 : bf16
    %13 = vector.broadcast %cst_6 : bf16 to vector<32x256xbf16>
    %14 = arith.mulf %13, %12 : vector<32x256xbf16>
    %15 = math.tanh %14 : vector<32x256xbf16>
    %cst_7 = arith.constant 1.000000e+00 : bf16
    %16 = vector.broadcast %cst_7 : bf16 to vector<32x256xbf16>
    %17 = arith.addf %16, %15 : vector<32x256xbf16>
    %cst_8 = arith.constant 5.000000e-01 : bf16
    %18 = vector.broadcast %cst_8 : bf16 to vector<32x256xbf16>
    %19 = arith.mulf %18, %17 : vector<32x256xbf16>
    %20 = arith.mulf %7, %19 : vector<32x256xbf16>
    %c0_9 = arith.constant 0 : index
    %c0_10 = arith.constant 0 : index
    %21 = vector.load %arg4[%c0_9, %c0_10] : memref<256x128xbf16, #tpu.memory_space<vmem>>, vector<256x128xbf16>
    %cst_11 = arith.constant dense<0.000000e+00> : vector<32x128xf32>
    %22 = tpu.matmul %20, %21, %cst_11 {dimension_numbers = #tpu.dot_dimension_numbers<[1], [0], [0], [1], [0, 0, 1, 1], [], []>} : vector<32x256xbf16>, vector<256x128xbf16>, vector<32x128xf32> -> vector<32x128xf32>
    %c0_12 = arith.constant 0 : index
    %c0_13 = arith.constant 0 : index
    %23 = vector.load %arg5[%c0_12, %c0_13] : memref<1x128xf32, #tpu.memory_space<vmem>>, vector<1x128xf32>
    %24 = vector.broadcast %23 : vector<1x128xf32> to vector<32x128xf32>
    %25 = arith.addf %22, %24 : vector<32x128xf32>
    %c0_14 = arith.constant 0 : index
    %c0_15 = arith.constant 0 : index
    %26 = vector.load %arg6[%c0_14, %c0_15] : memref<32x128xf32, #tpu.memory_space<vmem>>, vector<32x128xf32>
    tpu.vector_store %arg6[%c0_14, %c0_15], %25 {strides = array<i32>} : memref<32x128xf32, #tpu.memory_space<vmem>>, vector<32x128xf32>,
    return
  }
  func.func @transform_0(%arg0: i32) -> (i32, i32) {
    %c0_i32 = arith.constant 0 : i32
    %c0_i32_0 = arith.constant 0 : i32
    return %arg0, %c0_i32 : i32, i32
  }
  func.func @transform_1(%arg0: i32) -> (i32, i32) {
    %c0_i32 = arith.constant 0 : i32
    %c0_i32_0 = arith.constant 0 : i32
    %c0_i32_1 = arith.constant 0 : i32
    return %c0_i32, %c0_i32_0 : i32, i32
  }
  func.func @transform_2(%arg0: i32) -> (i32, i32) {
    %c0_i32 = arith.constant 0 : i32
    %c0_i32_0 = arith.constant 0 : i32
    %c0_i32_1 = arith.constant 0 : i32
    return %c0_i32, %c0_i32_0 : i32, i32
  }
  func.func @transform_3(%arg0: i32) -> (i32, i32) {
    %c0_i32 = arith.constant 0 : i32
    %c0_i32_0 = arith.constant 0 : i32
    %c0_i32_1 = arith.constant 0 : i32
    return %c0_i32, %c0_i32_0 : i32, i32
  }
  func.func @transform_4(%arg0: i32) -> (i32, i32) {
    %c0_i32 = arith.constant 0 : i32
    %c0_i32_0 = arith.constant 0 : i32
    %c0_i32_1 = arith.constant 0 : i32
    return %c0_i32, %c0_i32_0 : i32, i32
  }
  func.func @transform_5(%arg0: i32) -> (i32, i32) {
    %c0_i32 = arith.constant 0 : i32
    %c0_i32_0 = arith.constant 0 : i32
    return %arg0, %c0_i32 : i32, i32
  }
}

</mosaic_0001>

<bundles_post_ra>
// kernel: tpu_custom_call.1
= control target key start
LH: loop header
LB: loop body
LE: loop exit
PB: predicated region body
PF: predicated region fallthrough
CT: control target
= control target key end

     0   :  { %10 = vsyncpa [#allocation3], 0  ;;  %s1677_s0 = inlined_call_operand.hbm [shape: f32[128,128], index: 0, kind: input, shape index: {}]   ;;  %s1678_s1 = inlined_call_operand.hbm [shape: bf16[128,256], index: 1, kind: input, shape index: {}]   ;;  %s1679_s2 = inlined_call_operand.hbm [shape: f32[1,256], index: 2, kind: input, shape index: {}]   ;;  %s1680_s3 = inlined_call_operand.hbm [shape: bf16[256,128], index: 3, kind: input, shape index: {}]   ;;  %s1681_s4 = inlined_call_operand.vmem [shape: f32[1,128], index: 4, kind: input, shape index: {}]   ;;  %s1682_s5 = inlined_call_operand.hbm [shape: f32[128,128], index: 5, kind: output, shape index: {}]  }
   0x1   :  { %12 = vsyncpa [#allocation3 + $0x1], 0 }
   0x2   :  { %13 = vsyncpa [#allocation6], 0 }
   0x3   :  { %14 = vsyncpa [#allocation9], 0 }
   0x4   :  { %15 = vsyncpa [#allocation4], 0 }
   0x5   :  { %17 = vsyncpa [#allocation4 + $0x1], 0  ;;  %s1434_s18 = smov 0   ;;  %s1436_s19 = smov 0  }
   0x6   :  { %s1438_s20 = smov 0   ;;  %s1440_s21 = smov 0  }
   0x7 LB: > { %s1455_s22 = sadd.s32 4294967295, %s1393_s21   ;;  %s917_s23 = sadd.s32 4294967294, %s1393_s21   ;;  %s1393_s21 = sphi %s1440_s21, %s1694_s21   ;;  %s1389_s20 = sphi %s1438_s20, %s1693_s20   ;;  %s1385_s19 = sphi %s1436_s19, %s1692_s19   ;;  %s1381_s18 = sphi %s1434_s18, %s1691_s18  }
   0x8   : > { %p43_p0 = scmp.ne.s32.totalorder %s1385_s19, %s1381_s18  ;;  %p44_p1 = scmp.eq.s32.totalorder %s1455_s22, 0 }
   0x9   : > { %p151_p2 = scmp.eq.s32.totalorder %s1455_s22, 3  ;;  %p157_p3 = scmp.eq.s32.totalorder %s917_s23, 3 }
   0xa   : > { %p1464_p4 = por %p44_p1, %p43_p0  ;;  %p918_p5 = scmp.ge.s32.totalorder %s1393_s21, 1 }
   0xb   : > { %p1469_p6 = por %p157_p3, %p43_p0  ;;  %p164_p7 = scmp.lt.s32.totalorder %s1393_s21, 5 }
   0xc   : > { %s175_s28 = sshll.u32 %s1678_s1, 4  ;;  %s1395_s30 = smov [#allocation5]   ;;  %s176_s28 = int_to_ptr.hbm [resolvable:$true] %s175_s28 }
   0xd   : > { %p1477_p8 = pnand %p918_p5, %p164_p7  ;;  %s177_s6 = sshll.u32 %s1395_s30, 4  ;;  %s178_s6 = int_to_ptr.vmem [resolvable:$true] %s177_s6 }
   0xe   : > { %s190_s10 = sshll.u32 %s1679_s2, 4  ;;  %s1683_s11 = smov 128   ;;  %s191_s10 = int_to_ptr.hbm [resolvable:$true] %s190_s10 }
   0xf   : > { %p1115_p9 = pneg %p1477_p8  ;;  %s1397_s12 = smov 8  }
  0x10   : > { %s1398_s13 = smov [#allocation7]   ;;  %s201_s17 = sshll.u32 %s1680_s3, 4  ;;  %s202_s17 = int_to_ptr.hbm [resolvable:$true] %s201_s17 }
  0x11   : > { %p1485_p10 = pnand %p1115_p9, %p44_p1  ;;  %s192_s14 = sshll.u32 %s1398_s13, 4  ;;  %s193_s14 = int_to_ptr.vmem [resolvable:$true] %s192_s14 }
  0x12   : > { %s1399_s23 = smov [#allocation8]   ;;  %s1400_s27 = smov 64  }
  0x13   : > { %1118 = dma.hbm_to_vmem [thread:$0]  (!%p1485_p10), %s176_s28, 2048, %s178_s6, [#allocation6], %s1683_s11, %s1683_s11, %s1397_s12  }
  0x14   : > { %1121 = dma.hbm_to_vmem [thread:$0]  (!%p1485_p10), %s191_s10, 32, %s193_s14, [#allocation6]  }
  0x15   : > { %s203_s26 = sshll.u32 %s1399_s23, 4  ;;  %s1401_s28 = smov 4   ;;  %s204_s26 = int_to_ptr.vmem [resolvable:$true] %s203_s26 }
  0x16   : > { %1124 = dma.hbm_to_vmem [thread:$0]  (!%p1485_p10), %s202_s17, 2048, %s204_s26, [#allocation9], %s1400_s27, %s1400_s27, %s1401_s28  }
  0x17   : > { %s1505_s30 = sadd.s32 1, %s1393_s21   ;;  %s30_s8 = sadd.s32 1, %s1389_s20 }
  0x18   : > { %s27_s6 = ssub.s32 %s1393_s21, %s1505_s30  ;;  %p37_p12 = scmp.ne.s32.totalorder %s1389_s20, %s1385_s19 }
  0x19   : > { %p28_p11 = scmp.eq.s32.totalorder %s27_s6, 0  ;;  %p38_p13 = scmp.eq.s32.totalorder %s1393_s21, 0 }
  0x1a   : > { %p1518_p0 = por %p151_p2, %p37_p12  ;;  %p1136_p3 = scmp.lt.s32.totalorder %s1393_s21, 4 }
  0x1b   : > { %s1514_s9 = scalar_select %p28_p11, %s1389_s20, %s30_s8  }
  0x1c   : > { %s220_s13 = sand.u32 1, %s1389_s20   ;;  %s1065_s14 = sshll.u32 %s1393_s21, 5 }
  0x1d   : > { %p39_p5 = por %p38_p13, %p37_p12  ;;  %s923_s7 = sshll.u32 %s220_s13, 5 }
  0x1e   : > { %s229_s17 = scalar_lea.hbm %s1677_s0, %s1065_s14  ;;  %s224_s26 = scalar_lea.vmem [#allocation2], %s923_s7 }
  0x1f   : > { %s230_s23 = sshll.u32 %s229_s17, 4  ;;  %s232_s27 = sshll.u32 %s224_s26, 4  ;;  %s231_s23 = int_to_ptr.hbm [resolvable:$true] %s230_s23  ;;  %s233_s27 = int_to_ptr.vmem [resolvable:$true] %s232_s27 }
  0x20   : > { %p1528_p7 = pnand %p1136_p3, %p39_p5  ;;  %s221_s6 = scalar_lea.sflag [#allocation3], %s220_s13 }
  0x21   : > { %s1289_s8 = sshra.s32 %s231_s23, 4  ;;  %s1296_s7 = scalar_lea.hbm %s1677_s0, 128  ;;  %s1290_s8 = int_to_ptr.hbm [resolvable:$true] %s1289_s8 }
  0x22   : > { %s1291_s11 = scalar_lea.hbm %s1290_s8, 32  ;;  %p1293_p9 = pneg %p1528_p7 }
  0x23   : > { %p1292_p2 = scmp.ne.s32.totalorder %s1290_s8, %s1291_s11  ;;  %p1297_p12 = scmp.lt.s32.totalorder %s1290_s8, %s1677_s0 }
  0x24   : > { %p1298_p13 = scmp.lt.s32.totalorder %s1296_s7, %s1291_s11 }
  0x25   : > { %p1294_p10 = pnand %p1293_p9, %p1292_p2 }
  0x26   : > { %p1299_p3 = por %p1298_p13, %p1297_p12 }
  0x27   : > { %p1295_p11 = pneg %p1294_p10 }
  0x29   : > { %p1300_p5 = pnand %p1299_p3, %p1295_p11 }
  0x2b   : > { %1303 = shalt.err (!%p1300_p5)
}
  0x2c   : > { %s1690_s13 = smov 128   ;;  %244 = sbr.rel (%p1477_p8) target bundleno = 452 (0x1c4), region = 40 }
  0x2d   : > { %1128 = dma.hbm_to_vmem [thread:$0]  (!%p1528_p7), %s231_s23, 512, %s233_s27, %s221_s6, %s1690_s13, %s1690_s13, %s1397_s12  }
  0x2e   : > { %s1548_s26 = sand.u32 (!%p1477_p8), 1, %s1385_s19  }
  0x2f   : > { %s927_s11 = sshll.u32 (!%p1477_p8), %s1548_s26, 5  ;;  %s247_s8 = scalar_lea.sflag (!%p1477_p8), [#allocation3], %s1548_s26 }
  0x30   : > { %s1554_s14 = scalar_lea.vmem (!%p1477_p8), [#allocation2], %s927_s11 }
  0x31   : > { %1364 = dma.done.wait (%p1464_p4), %s247_s8, 512  }
  0x32   : > { %1366 = vsyncadd (%p1464_p4), %s247_s8, 4294966784 }
  0x33   : > { %1368 = dma.done.wait (%p44_p1), [#allocation6], 2080  }
  0x34   : > { %1370 = vsyncadd (%p44_p1), [#allocation6], 4294965216 }
  0x35   : > { %1372 = dma.done.wait (%p44_p1), [#allocation9], 2048  }
  0x36   : > { %1374 = vsyncadd (%p44_p1), [#allocation9], 4294965248  ;;  %v990_v0 = vld [vmem:[#allocation5 + $0x70] sm:$0xf]  ;;  %v1081_v1 = vld [vmem:[#allocation5 + $0x74] sm:$0xf0] }
  0x37   : > { %v1080_v2 = vld [vmem:[#allocation5 + $0x74] sm:$0xf]  ;;  %v991_v3 = vor.u32 %v1081_v1, %v990_v0  ;;  %v992_v4 = vld [vmem:[#allocation5 + $0x78] sm:$0xf0]  ;;  %v982_v5 = vld [vmem:[#allocation5 + $0x60] sm:$0xf] }
  0x38   : > { %v1079_v6 = vld [vmem:[#allocation5 + $0x64] sm:$0xf0]  ;;  %v995_v7 = vor.u32 %v1080_v2, %v992_v4  ;;  %v1078_v8 = vld [vmem:[#allocation5 + $0x64] sm:$0xf]  ;;  %v984_v9 = vld [vmem:[#allocation5 + $0x68] sm:$0xf0] }
  0x39   : > { %403 = vmatpush.bf16.msra.mxu0 %v991_v3  ;;  %v983_v10 = vor.u32 %v1079_v6, %v982_v5  ;;  %v987_v11 = vor.u32 %v1078_v8, %v984_v9  ;;  %v974_v12 = vld [vmem:[#allocation5 + $0x50] sm:$0xf]  ;;  %v1077_v13 = vld [vmem:[#allocation5 + $0x54] sm:$0xf0]  ;;  %v1076_v14 = vld [vmem:[#allocation5 + $0x54] sm:$0xf] }
  0x3a   : > { %422 = vmatpush.bf16.msra.mxu1 %v995_v7  ;;  %v976_v15 = vld [vmem:[#allocation5 + $0x58] sm:$0xf0]  ;;  %v975_v16 = vor.u32 %v1077_v13, %v974_v12  ;;  %v966_v18 = vld [vmem:[#allocation5 + $0x40] sm:$0xf]  ;;  %v1075_v19 = vld [vmem:[#allocation5 + $0x44] sm:$0xf0] }
  0x3b   : > { %v979_v17 = vor.u32 %v1076_v14, %v976_v15  ;;  %v1074_v20 = vld [vmem:[#allocation5 + $0x44] sm:$0xf]  ;;  %v968_v21 = vld [vmem:[#allocation5 + $0x48] sm:$0xf0]  ;;  %v967_v22 = vor.u32 %v1075_v19, %v966_v18  ;;  %v958_v24 = vld [vmem:[#allocation5 + $0x30] sm:$0xf] }
  0x3c   : > { %v971_v23 = vor.u32 %v1074_v20, %v968_v21  ;;  %v1073_v25 = vld [vmem:[#allocation5 + $0x34] sm:$0xf0]  ;;  %v1072_v26 = vld [vmem:[#allocation5 + $0x34] sm:$0xf]  ;;  %v960_v27 = vld [vmem:[#allocation5 + $0x38] sm:$0xf0] }
  0x3d   : > { %404 = vmatpush.bf16.msra.mxu0 %v983_v10  ;;  %v959_v28 = vor.u32 %v1073_v25, %v958_v24  ;;  %v963_v29 = vor.u32 %v1072_v26, %v960_v27  ;;  %v950_v30 = vld [vmem:[#allocation5 + $0x20] sm:$0xf]  ;;  %v1071_v31 = vld [vmem:[#allocation5 + $0x24] sm:$0xf0]  ;;  %v1070_v32 = vld [vmem:[#allocation5 + $0x24] sm:$0xf] }
  0x3e   : > { %423 = vmatpush.bf16.msra.mxu1 %v987_v11  ;;  %v952_v33 = vld [vmem:[#allocation5 + $0x28] sm:$0xf0]  ;;  %v951_v34 = vor.u32 %v1071_v31, %v950_v30  ;;  %v942_v36 = vld [vmem:[#allocation5 + $0x10] sm:$0xf]  ;;  %v1069_v37 = vld [vmem:[#allocation5 + $0x14] sm:$0xf0] }
  0x3f   : > { %v955_v35 = vor.u32 %v1070_v32, %v952_v33  ;;  %v1068_v38 = vld [vmem:[#allocation5 + $0x14] sm:$0xf]  ;;  %v944_v39 = vld [vmem:[#allocation5 + $0x18] sm:$0xf0]  ;;  %v943_v40 = vor.u32 %v1069_v37, %v942_v36  ;;  %v934_v42 = vld [vmem:[#allocation5] sm:$0xf] }
  0x40   : > { %v947_v41 = vor.u32 %v1068_v38, %v944_v39  ;;  %v1067_v43 = vld [vmem:[#allocation5 + $0x4] sm:$0xf0]  ;;  %v1066_v44 = vld [vmem:[#allocation5 + $0x4] sm:$0xf]  ;;  %v936_v45 = vld [vmem:[#allocation5 + $0x8] sm:$0xf0] }
  0x41   : > { %405 = vmatpush.bf16.msra.mxu0 %v975_v16  ;;  %v935_v46 = vor.u32 %v1067_v43, %v934_v42  ;;  %v295_v47 = vld [vmem:[%s1554_s14] sm:$0xff]  ;;  %v296_v48 = vld [vmem:[%s1554_s14 + $0x8] sm:$0xff]  ;;  %v939_v49 = vor.u32 %v1066_v44, %v936_v45  ;;  %v297_v51 = vld [vmem:[%s1554_s14 + $0x10] sm:$0xff]  ;;  %s292_s12 = scalar_lea.vmem [#allocation10], %s927_s11  ;;  %s1098_s23 = sshll.u32 %s1455_s22, 5 }
  0x42   : > { %424 = vmatpush.bf16.msra.mxu1 %v979_v17  ;;  %v299_v50 = vpack.c.bf16 %v296_v48, %v295_v47  ;;  %v298_v52 = vld [vmem:[%s1554_s14 + $0x18] sm:$0xff]  ;;  %v317_v54 = vld [vmem:[#allocation7] sm:$0x3]  ;;  %v1086_v38 = vld [vmem:[#allocation8 + $0x20] sm:$0xff]  ;;  %s811_s6 = scalar_lea.hbm %s1682_s5, %s1098_s23  ;;  %s812_s15 = sshll.u32 %s292_s12, 4  ;;  %s813_s15 = int_to_ptr.vmem [resolvable:$true] %s812_s15 }
  0x43   : > { %v300_v53 = vpack.c.bf16 %v298_v52, %v297_v51  ;;  %v1572_v55 = vperm.slane %v317_v54, 0  ;;  %v1574_v56 = vperm.slane %v317_v54, 1  ;;  %v1089_v7 = vld [vmem:[#allocation8 + $0x38] sm:$0xff]  ;;  %v1088_v16 = vld [vmem:[#allocation8 + $0x30] sm:$0xff]  ;;  %v1094_v39 = vld [vmem:[#allocation8 + $0x60] sm:$0xff]  ;;  %s814_s7 = sshll.u32 %s811_s6, 4  ;;  %s815_s7 = int_to_ptr.hbm [resolvable:$true] %s814_s7 }
  0x44   : > { %v1097_v8 = vld [vmem:[#allocation8 + $0x78] sm:$0xff]  ;;  %757 = vmatpush.bf16.msra.mxu2 %v1089_v7  ;;  %v1096_v17 = vld [vmem:[#allocation8 + $0x70] sm:$0xff]  ;;  %s800_s16 = scalar_lea.sflag [#allocation4], %s1548_s26  ;;  %s1333_s17 = sshra.s32 %s815_s7, 4  ;;  %s1334_s17 = int_to_ptr.hbm [resolvable:$true] %s1333_s17 }
  0x45   : > { %406 = vmatpush.bf16.msra.mxu0 %v967_v22  ;;  %776 = vmatpush.bf16.msra.mxu3 %v1097_v8  ;;  %v1085_v54 = vld [vmem:[#allocation8 + $0x18] sm:$0xff]  ;;  %v1092_v7 = vld [vmem:[#allocation8 + $0x50] sm:$0xff]  ;;  %s1335_s22 = scalar_lea.hbm %s1334_s17, 32  ;;  %s1339_s8 = scalar_lea.hbm %s1682_s5, 128 }
  0x46   : > { %425 = vmatpush.bf16.msra.mxu1 %v971_v23  ;;  %p1336_p1 = scmp.ne.s32.totalorder %s1334_s17, %s1335_s22  ;;  %p1340_p7 = scmp.lt.s32.totalorder %s1334_s17, %s1682_s5 }
  0x47   : > { %p1341_p2 = scmp.lt.s32.totalorder %s1339_s8, %s1335_s22 }
  0x48   : > { %758 = vmatpush.bf16.msra.mxu2 %v1088_v16  ;;  %p1337_p4 = pnand %p1336_p1, %p1518_p0 }
  0x49   : > { %407 = vmatpush.bf16.msra.mxu0 %v959_v28  ;;  %777 = vmatpush.bf16.msra.mxu3 %v1096_v17  ;;  %v1087_v28 = vld [vmem:[#allocation8 + $0x28] sm:$0xff]  ;;  %p1342_p9 = por %p1341_p2, %p1340_p7 }
  0x4a   : > { %426 = vmatpush.bf16.msra.mxu1 %v963_v29  ;;  %v1095_v29 = vld [vmem:[#allocation8 + $0x68] sm:$0xff]  ;;  %p1338_p8 = pneg %p1337_p4 }
  0x4b   : > { %v1083_v17 = vld [vmem:[#allocation8 + $0x8] sm:$0xff] }
  0x4c   : > { %759 = vmatpush.bf16.msra.mxu2 %v1087_v28  ;;  %p1343_p10 = pnand %p1342_p9, %p1338_p8 }
  0x4d   : > { %408 = vmatpush.bf16.msra.mxu0 %v951_v34  ;;  %778 = vmatpush.bf16.msra.mxu3 %v1095_v29 }
  0x4e   : > { %427 = vmatpush.bf16.msra.mxu1 %v955_v35 }
  0x50   : > { %760 = vmatpush.bf16.msra.mxu2 %v1086_v38 }
  0x51   : > { %409 = vmatpush.bf16.msra.mxu0 %v943_v40  ;;  %779 = vmatpush.bf16.msra.mxu3 %v1094_v39 }
  0x52   : > { %428 = vmatpush.bf16.msra.mxu1 %v947_v41 }
  0x54   : > { %761 = vmatpush.bf16.msra.mxu2 %v1085_v54 }
  0x55   : > { %410 = vmatpush.bf16.msra.mxu0 %v935_v46 }
  0x56   : > { %429 = vmatpush.bf16.msra.mxu1 %v939_v49 }
  0x58   : > { %411 = vmatmul.bf16.vlgmr.msra.gmra.mxu0 %v299_v50 }
  0x59   : > { %430 = vmatmul.bf16.vlgmr.msra.gmra.mxu1 %v299_v50 }
  0x68   : > { %416 = vmatmul.bf16.gmra.mxu0 %v300_v53 }
  0x69   : > { %435 = vmatmul.bf16.gmra.mxu1 %v300_v53 }
  0xd5   : > { %v412_v57 = vpop.f32.mrf.mxu0 }
  0xd6   : > { %v413_v58 = vadd.f32 %v412_v57, %v1572_v55  ;;  %v431_v59 = vpop.f32.mrf.mxu1  ;;  %v1093_v57 = vld [vmem:[#allocation8 + $0x58] sm:$0xff] }
  0xd7   : > { %v432_v60 = vadd.f32 %v431_v59, %v1574_v56  ;;  %780 = vmatpush.bf16.msra.mxu3 %v1093_v57 }
  0xd9   : > { %v441_v61 = vpack.c.bf16 %v432_v60, %v413_v58 }
  0xdb   : > { %v1578_v62 = vunpack.c.l.bf16 %v441_v61  ;;  %v1580_v63 = vunpack.c.h.bf16 %v441_v61  ;;  %781 = vmatpush.bf16.msra.mxu3 %v1092_v7 }
  0xdd   : > { %v453_v0 = vmul.f32 %v1578_v62, %v1578_v62  ;;  %v454_v1 = vmul.f32 %v1580_v63, %v1580_v63  ;;  %v414_v2 = vpop.f32.mrf.mxu0 }
  0xde   : > { %v415_v3 = vadd.f32 %v414_v2, %v1572_v55  ;;  %v433_v4 = vpop.f32.mrf.mxu1 }
  0xdf   : > { %v461_v5 = vpack.c.bf16 %v454_v1, %v453_v0  ;;  %v434_v6 = vadd.f32 %v433_v4, %v1574_v56 }
  0xe1   : > { %v465_v9 = vunpack.c.l.bf16 %v461_v5  ;;  %v466_v10 = vunpack.c.h.bf16 %v461_v5  ;;  %v442_v11 = vpack.c.bf16 %v434_v6, %v415_v3  ;;  %v1084_v6 = vld [vmem:[#allocation8 + $0x10] sm:$0xff] }
  0xe2   : > { %762 = vmatpush.bf16.msra.mxu2 %v1084_v6 }
  0xe3   : > { %v473_v12 = vmul.f32 %v465_v9, %v1578_v62  ;;  %v474_v13 = vmul.f32 %v466_v10, %v1580_v63  ;;  %v1590_v14 = vunpack.c.l.bf16 %v442_v11  ;;  %v1592_v15 = vunpack.c.h.bf16 %v442_v11 }
  0xe5   : > { %v481_v18 = vpack.c.bf16 %v474_v13, %v473_v12  ;;  %v455_v19 = vmul.f32 %v1590_v14, %v1590_v14  ;;  %v456_v20 = vmul.f32 %v1592_v15, %v1592_v15  ;;  %v417_v21 = vpop.f32.mrf.mxu0 }
  0xe6   : > { %v418_v22 = vadd.f32 %v417_v21, %v1572_v55  ;;  %v436_v23 = vpop.f32.mrf.mxu1  ;;  %763 = vmatpush.bf16.msra.mxu2 %v1083_v17 }
  0xe7   : > { %v485_v24 = vunpack.c.l.bf16 %v481_v18  ;;  %v486_v25 = vunpack.c.h.bf16 %v481_v18  ;;  %v462_v26 = vpack.c.bf16 %v456_v20, %v455_v19  ;;  %v437_v27 = vadd.f32 %v436_v23, %v1574_v56  ;;  %v1091_v18 = vld [vmem:[#allocation8 + $0x48] sm:$0xff] }
  0xe8   : > { %782 = vmatpush.bf16.msra.mxu3 %v1091_v18 }
  0xe9   : > { %v493_v30 = vmul.f32 0.044677734, %v485_v24  ;;  %v494_v31 = vmul.f32 0.044677734, %v486_v25  ;;  %v467_v32 = vunpack.c.l.bf16 %v462_v26  ;;  %v468_v33 = vunpack.c.h.bf16 %v462_v26 }
  0xea   : > { %v443_v34 = vpack.c.bf16 %v437_v27, %v418_v22 }
  0xeb   : > { %v501_v35 = vpack.c.bf16 %v494_v31, %v493_v30  ;;  %v475_v36 = vmul.f32 %v467_v32, %v1590_v14  ;;  %v476_v37 = vmul.f32 %v468_v33, %v1592_v15  ;;  %v1082_v31 = vld [vmem:[#allocation8] sm:$0xff] }
  0xec   : > { %v1602_v40 = vunpack.c.l.bf16 %v443_v34  ;;  %v1604_v41 = vunpack.c.h.bf16 %v443_v34  ;;  %v1090_v32 = vld [vmem:[#allocation8 + $0x40] sm:$0xff]  ;;  %764 = vmatpush.bf16.msra.mxu2 %v1082_v31 }
  0xed   : > { %v505_v42 = vunpack.c.l.bf16 %v501_v35  ;;  %v506_v43 = vunpack.c.h.bf16 %v501_v35  ;;  %v482_v44 = vpack.c.bf16 %v476_v37, %v475_v36  ;;  %v419_v45 = vpop.f32.mrf.mxu0  ;;  %783 = vmatpush.bf16.msra.mxu3 %v1090_v32 }
  0xee   : > { %v457_v46 = vmul.f32 %v1602_v40, %v1602_v40  ;;  %v458_v47 = vmul.f32 %v1604_v41, %v1604_v41  ;;  %v420_v48 = vadd.f32 %v419_v45, %v1572_v55  ;;  %v438_v49 = vpop.f32.mrf.mxu1 }
  0xef   : > { %v513_v50 = vadd.f32 %v505_v42, %v1578_v62  ;;  %v514_v51 = vadd.f32 %v506_v43, %v1580_v63  ;;  %v487_v52 = vunpack.c.l.bf16 %v482_v44  ;;  %v488_v53 = vunpack.c.h.bf16 %v482_v44 }
  0xf0   : > { %v463_v58 = vpack.c.bf16 %v458_v47, %v457_v46  ;;  %v439_v59 = vadd.f32 %v438_v49, %v1574_v56 }
  0xf1   : > { %v521_v60 = vpack.c.bf16 %v514_v51, %v513_v50  ;;  %v495_v61 = vmul.f32 0.044677734, %v487_v52  ;;  %v496_v0 = vmul.f32 0.044677734, %v488_v53 }
  0xf2   : > { %v469_v1 = vunpack.c.l.bf16 %v463_v58  ;;  %v470_v2 = vunpack.c.h.bf16 %v463_v58  ;;  %v444_v55 = vpack.c.bf16 %v439_v59, %v420_v48 }
  0xf3   : > { %v525_v3 = vunpack.c.l.bf16 %v521_v60  ;;  %v526_v4 = vunpack.c.h.bf16 %v521_v60  ;;  %v502_v5 = vpack.c.bf16 %v496_v0, %v495_v61 }
  0xf4   : > { %v477_v8 = vmul.f32 %v469_v1, %v1602_v40  ;;  %v478_v9 = vmul.f32 %v470_v2, %v1604_v41  ;;  %v1616_v10 = vunpack.c.l.bf16 %v444_v55  ;;  %v1618_v56 = vunpack.c.h.bf16 %v444_v55 }
  0xf5   : > { %v533_v11 = vmul.f32 0.796875, %v525_v3  ;;  %v534_v12 = vmul.f32 0.796875, %v526_v4  ;;  %v507_v13 = vunpack.c.l.bf16 %v502_v5  ;;  %v508_v16 = vunpack.c.h.bf16 %v502_v5 }
  0xf6   : > { %v483_v19 = vpack.c.bf16 %v478_v9, %v477_v8  ;;  %v459_v20 = vmul.f32 %v1616_v10, %v1616_v10  ;;  %v460_v21 = vmul.f32 %v1618_v56, %v1618_v56 }
  0xf7   : > { %v541_v22 = vpack.c.bf16 %v534_v12, %v533_v11  ;;  %v515_v23 = vadd.f32 %v507_v13, %v1590_v14  ;;  %v516_v24 = vadd.f32 %v508_v16, %v1592_v15 }
  0xf8   : > { %v489_v25 = vunpack.c.l.bf16 %v483_v19  ;;  %v490_v26 = vunpack.c.h.bf16 %v483_v19  ;;  %v464_v27 = vpack.c.bf16 %v460_v21, %v459_v20 }
  0xf9   : > { %v545_v28 = vunpack.c.l.bf16 %v541_v22  ;;  %v546_v29 = vunpack.c.h.bf16 %v541_v22  ;;  %v522_v30 = vpack.c.bf16 %v516_v24, %v515_v23 }
  0xfa   : > { %v497_v33 = vmul.f32 0.044677734, %v489_v25  ;;  %v498_v34 = vmul.f32 0.044677734, %v490_v26  ;;  %v471_v35 = vunpack.c.l.bf16 %v464_v27  ;;  %v472_v36 = vunpack.c.h.bf16 %v464_v27 }
  0xfb   : > { %1183 = vtanh.f32 %v545_v28  ;;  %v527_v37 = vunpack.c.l.bf16 %v522_v30  ;;  %v528_v38 = vunpack.c.h.bf16 %v522_v30 }
  0xfc   : > { %1185 = vtanh.f32 %v546_v29  ;;  %v503_v39 = vpack.c.bf16 %v498_v34, %v497_v33  ;;  %v479_v42 = vmul.f32 %v471_v35, %v1616_v10  ;;  %v480_v43 = vmul.f32 %v472_v36, %v1618_v56 }
  0xfd   : > { %v535_v44 = vmul.f32 0.796875, %v527_v37  ;;  %v536_v45 = vmul.f32 0.796875, %v528_v38 }
  0xfe   : > { %v509_v46 = vunpack.c.l.bf16 %v503_v39  ;;  %v510_v47 = vunpack.c.h.bf16 %v503_v39  ;;  %v484_v48 = vpack.c.bf16 %v480_v43, %v479_v42 }
  0xff   : > { %v542_v49 = vpack.c.bf16 %v536_v45, %v535_v44 }
 0x100   : > { %v517_v50 = vadd.f32 %v509_v46, %v1602_v40  ;;  %v518_v51 = vadd.f32 %v510_v47, %v1604_v41  ;;  %v491_v52 = vunpack.c.l.bf16 %v484_v48  ;;  %v492_v53 = vunpack.c.h.bf16 %v484_v48 }
 0x101   : > { %v1184_v54 = vpop.eup %1183  ;;  %v547_v57 = vunpack.c.l.bf16 %v542_v49  ;;  %v548_v58 = vunpack.c.h.bf16 %v542_v49 }
 0x102   : > { %v1186_v59 = vpop.eup %1185  ;;  %v523_v60 = vpack.c.bf16 %v518_v51, %v517_v50  ;;  %v499_v61 = vmul.f32 0.044677734, %v491_v52  ;;  %v500_v0 = vmul.f32 0.044677734, %v492_v53 }
 0x103   : > { %1187 = vtanh.f32 %v547_v57  ;;  %v561_v1 = vpack.c.bf16 %v1186_v59, %v1184_v54 }
 0x104   : > { %1189 = vtanh.f32 %v548_v58  ;;  %v529_v2 = vunpack.c.l.bf16 %v523_v60  ;;  %v530_v55 = vunpack.c.h.bf16 %v523_v60  ;;  %v504_v3 = vpack.c.bf16 %v500_v0, %v499_v61 }
 0x105   : > { %v565_v4 = vunpack.c.l.bf16 %v561_v1  ;;  %v566_v5 = vunpack.c.h.bf16 %v561_v1 }
 0x106   : > { %v537_v6 = vmul.f32 0.796875, %v529_v2  ;;  %v538_v7 = vmul.f32 0.796875, %v530_v55  ;;  %v511_v8 = vunpack.c.l.bf16 %v504_v3  ;;  %v512_v9 = vunpack.c.h.bf16 %v504_v3 }
 0x107   : > { %v573_v11 = vadd.f32 1.0, %v565_v4  ;;  %v574_v12 = vadd.f32 1.0, %v566_v5 }
 0x108   : > { %v543_v13 = vpack.c.bf16 %v538_v7, %v537_v6  ;;  %v519_v16 = vadd.f32 %v511_v8, %v1616_v10  ;;  %v520_v17 = vadd.f32 %v512_v9, %v1618_v56 }
 0x109   : > { %v1188_v18 = vpop.eup %1187  ;;  %v581_v19 = vpack.c.bf16 %v574_v12, %v573_v11 }
 0x10a   : > { %v1190_v20 = vpop.eup %1189  ;;  %v549_v21 = vunpack.c.l.bf16 %v543_v13  ;;  %v550_v22 = vunpack.c.h.bf16 %v543_v13  ;;  %v524_v23 = vpack.c.bf16 %v520_v17, %v519_v16 }
 0x10b   : > { %v562_v24 = vpack.c.bf16 %v1190_v20, %v1188_v18  ;;  %v585_v25 = vunpack.c.l.bf16 %v581_v19  ;;  %v586_v26 = vunpack.c.h.bf16 %v581_v19 }
 0x10c   : > { %1191 = vtanh.f32 %v549_v21  ;;  %v531_v27 = vunpack.c.l.bf16 %v524_v23  ;;  %v532_v28 = vunpack.c.h.bf16 %v524_v23 }
 0x10d   : > { %1193 = vtanh.f32 %v550_v22  ;;  %v567_v29 = vunpack.c.l.bf16 %v562_v24  ;;  %v568_v30 = vunpack.c.h.bf16 %v562_v24  ;;  %v593_v35 = vmul.f32 0.5, %v585_v25 }
 0x10e   : > { %v539_v31 = vmul.f32 0.796875, %v531_v27  ;;  %v540_v32 = vmul.f32 0.796875, %v532_v28  ;;  %v594_v36 = vmul.f32 0.5, %v586_v26 }
 0x10f   : > { %v575_v33 = vadd.f32 1.0, %v567_v29  ;;  %v576_v34 = vadd.f32 1.0, %v568_v30 }
 0x110   : > { %v544_v37 = vpack.c.bf16 %v540_v32, %v539_v31  ;;  %v601_v47 = vpack.c.bf16 %v594_v36, %v593_v35 }
 0x111   : > { %v582_v38 = vpack.c.bf16 %v576_v34, %v575_v33  ;;  %v1182_v33 = vld [vmem:[%s1681_s4] ss:$0 sm:$0xff] }
 0x112   : > { %v1192_v39 = vpop.eup %1191  ;;  %v551_v42 = vunpack.c.l.bf16 %v544_v37  ;;  %v552_v43 = vunpack.c.h.bf16 %v544_v37  ;;  %v605_v54 = vunpack.c.l.bf16 %v601_v47  ;;  %v606_v57 = vunpack.c.h.bf16 %v601_v47 }
 0x113   : > { %v1194_v44 = vpop.eup %1193  ;;  %v587_v45 = vunpack.c.l.bf16 %v582_v38  ;;  %v588_v46 = vunpack.c.h.bf16 %v582_v38 }
 0x114   : > { %1195 = vtanh.f32 %v551_v42  ;;  %v563_v48 = vpack.c.bf16 %v1194_v44, %v1192_v39  ;;  %v613_v55 = vmul.f32 %v605_v54, %v1578_v62  ;;  %v614_v4 = vmul.f32 %v606_v57, %v1580_v63 }
 0x115   : > { %1197 = vtanh.f32 %v552_v43  ;;  %v595_v49 = vmul.f32 0.5, %v587_v45  ;;  %v596_v50 = vmul.f32 0.5, %v588_v46 }
 0x116   : > { %v569_v51 = vunpack.c.l.bf16 %v563_v48  ;;  %v570_v52 = vunpack.c.h.bf16 %v563_v48 }
 0x117   : > { %v602_v53 = vpack.c.bf16 %v596_v50, %v595_v49 }
 0x118   : > { %v577_v58 = vadd.f32 1.0, %v569_v51  ;;  %v578_v59 = vadd.f32 1.0, %v570_v52 }
 0x119   : > { %v607_v60 = vunpack.c.l.bf16 %v602_v53  ;;  %v608_v61 = vunpack.c.h.bf16 %v602_v53 }
 0x11a   : > { %v1196_v0 = vpop.eup %1195  ;;  %v583_v1 = vpack.c.bf16 %v578_v59, %v577_v58 }
 0x11b   : > { %v1198_v2 = vpop.eup %1197  ;;  %v615_v3 = vmul.f32 %v607_v60, %v1590_v14  ;;  %v616_v5 = vmul.f32 %v608_v61, %v1592_v15 }
 0x11c   : > { %v564_v6 = vpack.c.bf16 %v1198_v2, %v1196_v0  ;;  %v589_v7 = vunpack.c.l.bf16 %v583_v1  ;;  %v590_v8 = vunpack.c.h.bf16 %v583_v1 }
 0x11d   : > { %v621_v9 = vpack.c.bf16 %v615_v3, %v613_v55  ;;  %v622_v11 = vpack.c.bf16 %v616_v5, %v614_v4 }
 0x11e   : > { %v571_v12 = vunpack.c.l.bf16 %v564_v6  ;;  %v572_v13 = vunpack.c.h.bf16 %v564_v6  ;;  %v597_v18 = vmul.f32 0.5, %v589_v7  ;;  %v598_v19 = vmul.f32 0.5, %v590_v8 }
 0x11f   : > { %765 = vmatmul.bf16.vlgmr.msra.gmra.mxu2 %v621_v9  ;;  %784 = vmatmul.bf16.vlgmr.msra.gmra.mxu3 %v622_v11 }
 0x120   : > { %v579_v16 = vadd.f32 1.0, %v571_v12  ;;  %v580_v17 = vadd.f32 1.0, %v572_v13  ;;  %v603_v21 = vpack.c.bf16 %v598_v19, %v597_v18 }
 0x122   : > { %v584_v62 = vpack.c.bf16 %v580_v17, %v579_v16  ;;  %v609_v23 = vunpack.c.l.bf16 %v603_v21  ;;  %v610_v24 = vunpack.c.h.bf16 %v603_v21 }
 0x124   : > { %v591_v20 = vunpack.c.l.bf16 %v584_v62  ;;  %v592_v14 = vunpack.c.h.bf16 %v584_v62  ;;  %v617_v27 = vmul.f32 %v609_v23, %v1602_v40  ;;  %v618_v29 = vmul.f32 %v610_v24, %v1604_v41 }
 0x126   : > { %v599_v63 = vmul.f32 0.5, %v591_v20  ;;  %v600_v22 = vmul.f32 0.5, %v592_v14 }
 0x128   : > { %v604_v15 = vpack.c.bf16 %v600_v22, %v599_v63 }
 0x12a   : > { %v611_v25 = vunpack.c.l.bf16 %v604_v15  ;;  %v612_v26 = vunpack.c.h.bf16 %v604_v15 }
 0x12c   : > { %v619_v28 = vmul.f32 %v611_v25, %v1616_v10  ;;  %v620_v30 = vmul.f32 %v612_v26, %v1618_v56 }
 0x12e   : > { %v623_v31 = vpack.c.bf16 %v619_v28, %v617_v27  ;;  %v624_v32 = vpack.c.bf16 %v620_v30, %v618_v29 }
 0x130   : > { %770 = vmatmul.bf16.gmra.mxu2 %v623_v31  ;;  %789 = vmatmul.bf16.gmra.mxu3 %v624_v32 }
 0x1a2   : > { %v766_v34 = vpop.f32.mrf.mxu2  ;;  %v785_v35 = vpop.f32.mrf.mxu3 }
 0x1a3   : > { %v767_v36 = vadd.f32 %v1182_v33, %v766_v34 }
 0x1a5   : > { %v786_v37 = vadd.f32 %v785_v35, %v767_v36 }
 0x1a7   : > { %795 = vst [vmem:[%s292_s12] sm:$0xff] %v786_v37 }
 0x1aa   : > { %v768_v40 = vpop.f32.mrf.mxu2  ;;  %v787_v41 = vpop.f32.mrf.mxu3 }
 0x1ab   : > { %v769_v10 = vadd.f32 %v1182_v33, %v768_v40 }
 0x1ad   : > { %v788_v56 = vadd.f32 %v787_v41, %v769_v10 }
 0x1af   : > { %796 = vst [vmem:[%s292_s12 + $0x8] sm:$0xff] %v788_v56 }
 0x1b3   : > { %v771_v38 = vpop.f32.mrf.mxu2  ;;  %v790_v39 = vpop.f32.mrf.mxu3 }
 0x1b4   : > { %v772_v42 = vadd.f32 %v1182_v33, %v771_v38 }
 0x1b6   : > { %v791_v43 = vadd.f32 %v790_v39, %v772_v42 }
 0x1b8   : > { %797 = vst [vmem:[%s292_s12 + $0x10] sm:$0xff] %v791_v43 }
 0x1bb   : > { %v773_v44 = vpop.f32.mrf.mxu2  ;;  %v792_v46 = vpop.f32.mrf.mxu3 }
 0x1bc   : > { %v774_v45 = vadd.f32 %v1182_v33, %v773_v44 }
 0x1be   : > { %v793_v47 = vadd.f32 %v792_v46, %v774_v45 }
 0x1c0   : > { %798 = vst [vmem:[%s292_s12 + $0x18] sm:$0xff] %v793_v47 }
 0x1c1   : > { %1346 = shalt.err (!%p1343_p10)
}
 0x1c2   : > { %s1402_s26 = smov 128   ;;  %s1403_s29 = smov 8  }
 0x1c3   : > { %1113 = dma.vmem_to_hbm [thread:$0]  (%p1518_p0), %s813_s15, 512, %s815_s7, %s800_s16, %s1402_s26, %s1402_s26, %s1403_s29  }
 0x1c4 PF: > { %p1140_p11 = scmp.ge.s32.totalorder %s1393_s21, 2  ;;  %s829_s12 = sand.u32 1, %s1381_s18  }
 0x1c5   : > { %s830_s23 = scalar_lea.sflag [#allocation4], %s829_s12 }
 0x1c6   : > { %p1130_p12 = pnand %p1140_p11, %p1469_p6 }
 0x1c8   : > { %p1131_p13 = pneg %p1130_p12 }
 0x1ca   : > { %1376 = dma.done.wait (%p1131_p13), %s830_s23, 512  }
 0x1cb   : > { %1378 = vsyncadd (%p1131_p13), %s830_s23, 4294966784  ;;  %p20_p3 = scmp.ge.s32.totalorder %s1505_s30, 6   ;;  %s1691_s18 = smov %s1385_s19 }
 0x1cc   : > { %s1692_s19 = smov %s1389_s20  ;;  %s1693_s20 = smov %s1514_s9 }
 0x1cd   : > { %s1694_s21 = smov %s1505_s30  ;;  %22 = sbr.rel (!%p20_p3) target bundleno = 7 (0x7), region = 97 }
 0x1d2   :  { %836 = vsyncpa [#allocation3], 1 }
 0x1d3   :  { %838 = vsyncpa [#allocation3 + $0x1], 1 }
 0x1d4   :  { %839 = vsyncpa [#allocation6], 1 }
 0x1d5   :  { %840 = vsyncpa [#allocation9], 1 }
 0x1d6   :  { %841 = vsyncpa [#allocation4], 1 }
 0x1d7   :  { %843 = vsyncpa [#allocation4 + $0x1], 1 }

</bundles_post_ra>
